<compile_context>
chip_gen: v5e
topology: v5e:2x2
jax: 0.10.0
libtpu: 0.0.40
codegen_flags: <defaults>
</compile_context>

<pallas_src>
import functools

import jax
import jax.numpy as jnp
from jax.experimental import pallas as pl
from jax.experimental.pallas import tpu as pltpu

_LANE = 128


def _round_up(x, m):
    return (x + m - 1) // m * m


def _cdiv(a, b):
    return -(-a // b)


def _select_batch_tile(n, batch_tile):
    """Pick an MXU-aligned batch tile: big enough to amortize per-step
    overhead, small enough to avoid over-padding, and >=2 grid steps for
    mid/large batches (feeds both v7x TensorCores + enables pipelining)."""
    n_lane = _round_up(max(n, 1), _LANE)
    tile = _round_up(max(batch_tile, _LANE), _LANE)
    if n_lane <= _LANE:
        return _LANE
    if n_lane <= tile:
        # Split into (at least) two grid steps.
        return _round_up(_cdiv(n_lane, 2), _LANE)
    return tile


def mlp_kernel(xt_ref, w1t_ref, w2t_ref, w3r_ref, b12_ref, b3_ref, o_ref):
    # Everything is transposed: batch on lanes, features/hiddens on sublanes.
    cdt = w1t_ref.dtype    # matmul input dtype (bf16 fast path / f32 parity)
    edt = b12_ref.dtype    # epilogue (bias + ReLU) dtype

    # Layer 1: h1^T = relu(W1^T @ x^T + b1)  -> (HP, tile)
    h1 = jnp.dot(w1t_ref[...], xt_ref[...], preferred_element_type=jnp.float32)
    h1 = jnp.maximum(h1.astype(edt) + b12_ref[0], 0)

    # Layer 2: h2^T = relu(W2^T @ h1^T + b2) -> (HP, tile)
    h2 = jnp.dot(w2t_ref[...], h1.astype(cdt), preferred_element_type=jnp.float32)
    h2 = jnp.maximum(h2.astype(edt) + b12_ref[1], 0)

    # Output layer (HP -> 1) on the MXU: w3 is row 0 of an (8, HP) block.
    # Rows 1..7 are zero padding; only row 0 of the result is real.
    y8 = jnp.dot(w3r_ref[...], h2.astype(cdt), preferred_element_type=jnp.float32)
    o_ref[...] = (y8[0:1, :] + b3_ref[...]).astype(o_ref.dtype)


def prepare_params(params, compute_dtype=jnp.bfloat16, epilogue_dtype=None):
    """One-time layout plumbing: transpose, zero-pad hidden dims to 128, cast.

    params: (w1, b1, w2, b2, w3, b3) with w stored as [in, out], b as [1, out]
            (i.e. y = x @ w + b, matching torch Linear with W transposed).
    compute_dtype:  matmul-operand dtype (bf16 = MXU fast path on all chips).
    epilogue_dtype: dtype for the bias-add/ReLU (default = compute_dtype;
                    pass jnp.float32 on v5e, which has no bf16 VALU).
    """
    if epilogue_dtype is None:
        epilogue_dtype = compute_dtype
    w1, b1, w2, b2, w3, b3 = params
    n_in, nh1 = w1.shape
    nh2 = w2.shape[1]
    n_out = w3.shape[1]
    assert n_out == 1, "kernel output path is specialized to n_outputs == 1"

    hp = _round_up(max(nh1, nh2), _LANE)
    cdt = compute_dtype
    edt = epilogue_dtype

    w1t = jnp.zeros((hp, n_in), cdt).at[:nh1, :].set(w1.T.astype(cdt))
    w2t = jnp.zeros((hp, hp), cdt).at[:nh2, :nh1].set(w2.T.astype(cdt))
    # w3 as an (8, HP) MXU operand: real weights in row 0, rows 1..7 zero.
    w3r = jnp.zeros((8, hp), cdt).at[0, :nh2].set(w3[:, 0].astype(cdt))
    # b1/b2 packed into a single (2, HP, 1) block (sliced by leading index).
    b12 = (jnp.zeros((2, hp, 1), edt)
           .at[0, :nh1, 0].set(b1.reshape(-1).astype(edt))
           .at[1, :nh2, 0].set(b2.reshape(-1).astype(edt)))
    # Final bias stays f32 (added after the f32-accumulated output matmul).
    b3c = b3.reshape(1, 1).astype(jnp.float32)
    return (w1t, w2t, w3r, b12, b3c)


@functools.partial(jax.jit, static_argnames=("batch_tile",))
def nnet_forward(x, prepared, *, batch_tile=8192):
    """Fused forward of NNet(n_inputs, [100, 100], 1, act_func='relu')."""
    w1t, w2t, w3r, b12, b3c = prepared
    n, n_in = x.shape
    hp = w1t.shape[0]
    cdt = w1t.dtype

    tile = _select_batch_tile(n, batch_tile)
    n_pad = _round_up(max(n, 1), tile)
    grid = (n_pad // tile,)

    # Single fused pad + transpose + cast (inside the jit, fused by XLA).
    # TODO(synk): accept x already feature-major / normalized to skip this relayout.
    xt = jnp.pad(x, ((0, n_pad - n), (0, 0))).T.astype(cdt)

    def fixed2(shape):
        # Weights/biases: same full block every grid step (fetched once).
        return pl.BlockSpec(shape, lambda i: (0, 0))

    flops = 2 * n_pad * (n_in * hp + hp * hp + 8 * hp)
    bytes_accessed = (
        xt.size * xt.dtype.itemsize
        + sum(int(a.size) * a.dtype.itemsize for a in (w1t, w2t, w3r, b12, b3c))
        + n_pad * 4
    )

    out = pl.pallas_call(
        mlp_kernel,
        out_shape=jax.ShapeDtypeStruct((1, n_pad), jnp.float32),
        grid_spec=pltpu.PrefetchScalarGridSpec(
            num_scalar_prefetch=0,
            grid=grid,
            in_specs=[
                pl.BlockSpec((n_in, tile), lambda i: (0, i)),   # x^T tile (lane-dense)
                fixed2((hp, n_in)),                             # W1^T
                fixed2((hp, hp)),                               # W2^T
                fixed2((8, hp)),                                # w3 row-block (MXU)
                pl.BlockSpec((2, hp, 1), lambda i: (0, 0, 0)),  # packed b1/b2 columns
                fixed2((1, 1)),                                 # b3 (f32)
            ],
            out_specs=pl.BlockSpec((1, tile), lambda i: (0, i)),  # lane-dense output
        ),
        compiler_params=pltpu.CompilerParams(
            dimension_semantics=("parallel",),
            vmem_limit_bytes=48 * 1024 * 1024,
        ),
        cost_estimate=pl.CostEstimate(
            flops=int(flops), transcendentals=0, bytes_accessed=int(bytes_accessed)),
    )(xt, w1t, w2t, w3r, b12, b3c)

    # Drop batch padding, restore [N, 1] shape.
    return out[0, :n].reshape(n, 1)


def init_params(key, n_inputs=5, n_hiddens=(100, 100), n_outputs=1):
    """Deterministic init mirroring torch.nn.Linear's U(-1/sqrt(fan_in), ...)."""
    sizes = [n_inputs, *n_hiddens, n_outputs]
    params = []
    for fan_in, fan_out in zip(sizes[:-1], sizes[1:]):
        key, kw, kb = jax.random.split(key, 3)
        bound = 1.0 / jnp.sqrt(jnp.float32(fan_in))
        w = jax.random.uniform(kw, (fan_in, fan_out), jnp.float32, -bound, bound)
        b = jax.random.uniform(kb, (1, fan_out), jnp.float32, -bound, bound)
        params += [w, b]
    return tuple(params)


def nnet_forward_ref(x, params):
    w1, b1, w2, b2, w3, b3 = params
    h1 = jnp.maximum(x @ w1 + b1, 0.0)
    h2 = jnp.maximum(h1 @ w2 + b2, 0.0)
    return h2 @ w3 + b3


if __name__ == "__main__":
    key = jax.random.PRNGKey(0)
    key, kx = jax.random.split(key)

    # Airfoil-style input: 5 features (frequency, angle, chord, velocity, thickness)
    N, N_IN = 16, 5
    x = jax.random.normal(kx, (N, N_IN), jnp.float32)

    params = init_params(key, n_inputs=N_IN, n_hiddens=(100, 100), n_outputs=1)
    y_ref = nnet_forward_ref(x, params)

    # Parity run: f32 matmuls + f32 epilogues (test-only path).
    prep_f32 = prepare_params(params, compute_dtype=jnp.float32)
    y_f32 = jax.block_until_ready(nnet_forward(x, prep_f32))
    assert y_f32.shape == (N, 1)
    assert jnp.allclose(y_f32, y_ref, atol=5e-4, rtol=5e-4), "f32 Pallas output mismatch"

    # Fast path: bf16 matmul operands + bf16 epilogues, f32 MXU accumulation.
    prep_bf16 = prepare_params(params)  # compute_dtype=bf16, epilogue=bf16 (v6e/v7x)
    y_bf16 = jax.block_until_ready(nnet_forward(x, prep_bf16))
    assert y_bf16.shape == (N, 1)
    assert jnp.allclose(y_bf16, y_ref, atol=2e-2, rtol=2e-2), "bf16 Pallas output mismatch"

    # Multi-step grid + batch-padding path (exercises constant-weight reuse
    # across grid steps and the >=2-step tile split).
    key, kx2 = jax.random.split(key)
    N2 = 300
    x2 = jax.random.normal(kx2, (N2, N_IN), jnp.float32)
    y2 = jax.block_until_ready(nnet_forward(x2, prep_bf16))
    y2_ref = nnet_forward_ref(x2, params)
    assert y2.shape == (N2, 1)
    assert jnp.allclose(y2, y2_ref, atol=2e-2, rtol=2e-2), "bf16 multi-tile output mismatch"

    print("KERNEL_OK")
</pallas_src>

<mosaic_0001>
module attributes {stable_mosaic.version = 11 : i64} {
  func.func @mlp_kernel(%arg0: i32, %arg1: memref<5x128xf32, #tpu.memory_space<vmem>>, %arg2: memref<128x5xf32, #tpu.memory_space<vmem>>, %arg3: memref<128x128xf32, #tpu.memory_space<vmem>>, %arg4: memref<8x128xf32, #tpu.memory_space<vmem>>, %arg5: memref<2x128x1xf32, #tpu.memory_space<vmem>>, %arg6: memref<1x1xf32, #tpu.memory_space<vmem>>, %arg7: memref<1x128xf32, #tpu.memory_space<vmem>>) attributes {dimension_semantics = [#tpu.dimension_semantics<parallel>], iteration_bounds = array<i64: 1>, scalar_prefetch = 0 : i64, scratch_operands = 0 : i64, tpu.core_type = #tpu.core_type<tc>, window_params = [{transform_indices = @transform_0, window_bounds = array<i64: 5, 128>}, {pipeline_mode = #tpu.pipeline_mode<synchronous>, transform_indices = @transform_1, window_bounds = array<i64: 128, 5>}, {pipeline_mode = #tpu.pipeline_mode<synchronous>, transform_indices = @transform_2, window_bounds = array<i64: 128, 128>}, {pipeline_mode = #tpu.pipeline_mode<synchronous>, transform_indices = @transform_3, window_bounds = array<i64: 8, 128>}, {pipeline_mode = #tpu.pipeline_mode<synchronous>, transform_indices = @transform_4, window_bounds = array<i64: 2, 128, 1>}, {pipeline_mode = #tpu.pipeline_mode<synchronous>, transform_indices = @transform_5, window_bounds = array<i64: 1, 1>}, {transform_indices = @transform_6, window_bounds = array<i64: 1, 128>}]} {
    %c0 = arith.constant 0 : index
    %c0_0 = arith.constant 0 : index
    %0 = vector.load %arg2[%c0, %c0_0] : memref<128x5xf32, #tpu.memory_space<vmem>>, vector<128x5xf32>
    %c0_1 = arith.constant 0 : index
    %c0_2 = arith.constant 0 : index
    %1 = vector.load %arg1[%c0_1, %c0_2] : memref<5x128xf32, #tpu.memory_space<vmem>>, vector<5x128xf32>
    %cst = arith.constant dense<0.000000e+00> : vector<128x128xf32>
    %2 = tpu.matmul %0, %1, %cst {dimension_numbers = #tpu.dot_dimension_numbers<[1], [0], [0], [1], [0, 0, 1, 1], [], []>} : vector<128x5xf32>, vector<5x128xf32>, vector<128x128xf32> -> vector<128x128xf32>
    %c0_3 = arith.constant 0 : index
    %c0_4 = arith.constant 0 : index
    %c0_5 = arith.constant 0 : index
    %3 = vector.load %arg5[%c0_3, %c0_4, %c0_5] : memref<2x128x1xf32, #tpu.memory_space<vmem>>, vector<1x128x1xf32>
    %4 = vector.shape_cast %3 : vector<1x128x1xf32> to vector<128x1xf32>
    %5 = vector.broadcast %4 : vector<128x1xf32> to vector<128x128xf32>
    %6 = arith.addf %2, %5 : vector<128x128xf32>
    %cst_6 = arith.constant 0.000000e+00 : f32
    %7 = vector.broadcast %cst_6 : f32 to vector<128x128xf32>
    %8 = arith.maximumf %6, %7 : vector<128x128xf32>
    %c0_7 = arith.constant 0 : index
    %c0_8 = arith.constant 0 : index
    %9 = vector.load %arg3[%c0_7, %c0_8] : memref<128x128xf32, #tpu.memory_space<vmem>>, vector<128x128xf32>
    %cst_9 = arith.constant dense<0.000000e+00> : vector<128x128xf32>
    %10 = tpu.matmul %9, %8, %cst_9 {dimension_numbers = #tpu.dot_dimension_numbers<[1], [0], [0], [1], [0, 0, 1, 1], [], []>} : vector<128x128xf32>, vector<128x128xf32>, vector<128x128xf32> -> vector<128x128xf32>
    %c1 = arith.constant 1 : index
    %c0_10 = arith.constant 0 : index
    %c0_11 = arith.constant 0 : index
    %11 = vector.load %arg5[%c1, %c0_10, %c0_11] : memref<2x128x1xf32, #tpu.memory_space<vmem>>, vector<1x128x1xf32>
    %12 = vector.shape_cast %11 : vector<1x128x1xf32> to vector<128x1xf32>
    %13 = vector.broadcast %12 : vector<128x1xf32> to vector<128x128xf32>
    %14 = arith.addf %10, %13 : vector<128x128xf32>
    %cst_12 = arith.constant 0.000000e+00 : f32
    %15 = vector.broadcast %cst_12 : f32 to vector<128x128xf32>
    %16 = arith.maximumf %14, %15 : vector<128x128xf32>
    %c0_13 = arith.constant 0 : index
    %c0_14 = arith.constant 0 : index
    %17 = vector.load %arg4[%c0_13, %c0_14] : memref<8x128xf32, #tpu.memory_space<vmem>>, vector<8x128xf32>
    %cst_15 = arith.constant dense<0.000000e+00> : vector<8x128xf32>
    %18 = tpu.matmul %17, %16, %cst_15 {dimension_numbers = #tpu.dot_dimension_numbers<[1], [0], [0], [1], [0, 0, 1, 1], [], []>} : vector<8x128xf32>, vector<128x128xf32>, vector<8x128xf32> -> vector<8x128xf32>
    %19 = vector.extract_strided_slice %18 {offsets = [0, 0], sizes = [1, 128], strides = [1, 1]} : vector<8x128xf32> to vector<1x128xf32>
    %c0_16 = arith.constant 0 : index
    %c0_17 = arith.constant 0 : index
    %20 = vector.load %arg6[%c0_16, %c0_17] : memref<1x1xf32, #tpu.memory_space<vmem>>, vector<1x1xf32>
    %21 = vector.broadcast %20 : vector<1x1xf32> to vector<1x128xf32>
    %22 = arith.addf %19, %21 : vector<1x128xf32>
    %c0_18 = arith.constant 0 : index
    %c0_19 = arith.constant 0 : index
    %23 = vector.load %arg7[%c0_18, %c0_19] : memref<1x128xf32, #tpu.memory_space<vmem>>, vector<1x128xf32>
    tpu.vector_store %arg7[%c0_18, %c0_19], %22 {strides = array<i32>} : memref<1x128xf32, #tpu.memory_space<vmem>>, vector<1x128xf32>,
    return
  }
  func.func @transform_0(%arg0: i32) -> (i32, i32) {
    %c0_i32 = arith.constant 0 : i32
    %c0_i32_0 = arith.constant 0 : i32
    return %c0_i32, %arg0 : i32, i32
  }
  func.func @transform_1(%arg0: i32) -> (i32, i32) {
    %c0_i32 = arith.constant 0 : i32
    %c0_i32_0 = arith.constant 0 : i32
    %c0_i32_1 = arith.constant 0 : i32
    return %c0_i32, %c0_i32_0 : i32, i32
  }
  func.func @transform_2(%arg0: i32) -> (i32, i32) {
    %c0_i32 = arith.constant 0 : i32
    %c0_i32_0 = arith.constant 0 : i32
    %c0_i32_1 = arith.constant 0 : i32
    return %c0_i32, %c0_i32_0 : i32, i32
  }
  func.func @transform_3(%arg0: i32) -> (i32, i32) {
    %c0_i32 = arith.constant 0 : i32
    %c0_i32_0 = arith.constant 0 : i32
    %c0_i32_1 = arith.constant 0 : i32
    return %c0_i32, %c0_i32_0 : i32, i32
  }
  func.func @transform_4(%arg0: i32) -> (i32, i32, i32) {
    %c0_i32 = arith.constant 0 : i32
    %c0_i32_0 = arith.constant 0 : i32
    %c0_i32_1 = arith.constant 0 : i32
    %c0_i32_2 = arith.constant 0 : i32
    return %c0_i32, %c0_i32_0, %c0_i32_1 : i32, i32, i32
  }
  func.func @transform_5(%arg0: i32) -> (i32, i32) {
    %c0_i32 = arith.constant 0 : i32
    %c0_i32_0 = arith.constant 0 : i32
    %c0_i32_1 = arith.constant 0 : i32
    return %c0_i32, %c0_i32_0 : i32, i32
  }
  func.func @transform_6(%arg0: i32) -> (i32, i32) {
    %c0_i32 = arith.constant 0 : i32
    %c0_i32_0 = arith.constant 0 : i32
    return %c0_i32, %arg0 : i32, i32
  }
}

</mosaic_0001>

<bundles_post_ra>
// kernel: nnet_forward.1
= control target key start
LH: loop header
LB: loop body
LE: loop exit
PB: predicated region body
PF: predicated region fallthrough
CT: control target
= control target key end

     0   :  { %vm187_vm0 = vcmask 1044480   ;;  %v554_v0 = vmov 0   ;;  %vm138_vm1 = vcmask 39936   ;;  %s828_s4 = inlined_call_operand.vmem [shape: f32[2,128,1], index: 4, kind: input, shape index: {}]   ;;  %s829_s0 = inlined_call_operand.vmem [shape: f32[5,128], index: 0, kind: input, shape index: {}]   ;;  %s830_s1 = inlined_call_operand.vmem [shape: f32[128,5], index: 1, kind: input, shape index: {}]   ;;  %s831_s5 = inlined_call_operand.<no memory space> [shape: f32[1,1], index: 5, kind: input, shape index: {}]   ;;  %s832_s2 = inlined_call_operand.vmem [shape: f32[128,128], index: 2, kind: input, shape index: {}]   ;;  %s833_s3 = inlined_call_operand.vmem [shape: f32[8,128], index: 3, kind: input, shape index: {}]   ;;  %s834_s6 = inlined_call_operand.vmem [shape: f32[1,128], index: 6, kind: output, shape index: {}]  }
   0x1   :  { %552 = vset.pattern.permute.xlu1 %v554_v0  ;;  %551 = vset.pattern.permute.xlu0 %v554_v0  ;;  %v57_v1 = vld [vmem:[%s828_s4 + $0x78] sm:$0xff]  ;;  %v55_v2 = vld [vmem:[%s828_s4 + $0x68] sm:$0xff]  ;;  %v41_v3 = vld [vmem:[%s829_s0] sm:$0x1f]  ;;  %v11_v41 = vstv %s831_s5 }
   0x2   :  { %135 = vperm.xlu0 %551, %v57_v1   ;;  %125 = vperm.xlu1 %552, %v55_v2   ;;  %v25_v4 = vld [vmem:[%s830_s1] sm:$0xff]  ;;  %v36_v5 = vld [vmem:[%s830_s1 + $0x58] sm:$0xff]  ;;  %v56_v7 = vld [vmem:[%s828_s4 + $0x70] sm:$0xff]  ;;  %12 = vst [vmem:[#allocation2] sm:$0x1] %v11_v41 }
   0x3   :  { %500 = vmatpush.msk.msra.mxu0 %vm187_vm0, %v41_v3  ;;  %533 = vmatpush.msk.msra.mxu2 %vm187_vm0, %v41_v3  ;;  %v53_v6 = vld [vmem:[%s828_s4 + $0x58] sm:$0xff]  ;;  %v54_v8 = vld [vmem:[%s828_s4 + $0x60] sm:$0xff]  ;;  %v26_v9 = vld [vmem:[%s830_s1 + $0x8] sm:$0xff] }
   0x4   :  { %501 = vmatmul.msk.f32.vlgmr.msra.gmra.mxu0 %vm138_vm1, %v25_v4  ;;  %512 = vmatmul.msk.f32.vlgmr.msra.gmra.mxu2 %vm138_vm1, %v36_v5  ;;  %v37_v10 = vld [vmem:[%s830_s1 + $0x60] sm:$0xff]  ;;  %v52_v11 = vld [vmem:[%s828_s4 + $0x50] sm:$0xff]  ;;  %v51_v12 = vld [vmem:[%s828_s4 + $0x48] sm:$0xff] }
   0x5   :  { %553 = vset.pattern.permute.xlu2 %v554_v0  ;;  %v50_v13 = vld [vmem:[%s828_s4 + $0x40] sm:$0xff]  ;;  %v27_v14 = vld [vmem:[%s830_s1 + $0x10] sm:$0xff]  ;;  %v38_v15 = vld [vmem:[%s830_s1 + $0x68] sm:$0xff] }
   0x6   :  { %115 = vperm.xlu2 %553, %v53_v6   ;;  %v49_v16 = vld [vmem:[%s828_s4 + $0x38] sm:$0xff]  ;;  %v48_v17 = vld [vmem:[%s828_s4 + $0x30] sm:$0xff]  ;;  %v47_v18 = vld [vmem:[%s828_s4 + $0x28] sm:$0xff] }
   0x7   :  { %v28_v19 = vld [vmem:[%s830_s1 + $0x18] sm:$0xff]  ;;  %v39_v20 = vld [vmem:[%s830_s1 + $0x70] sm:$0xff]  ;;  %v46_v21 = vld [vmem:[%s828_s4 + $0x20] sm:$0xff] }
   0x8   :  { %v45_v22 = vld [vmem:[%s828_s4 + $0x18] sm:$0xff]  ;;  %v44_v23 = vld [vmem:[%s828_s4 + $0x10] sm:$0xff]  ;;  %v29_v24 = vld [vmem:[%s830_s1 + $0x20] sm:$0xff] }
   0x9   :  { %v40_v25 = vld [vmem:[%s830_s1 + $0x78] sm:$0xff]  ;;  %v43_v26 = vld [vmem:[%s828_s4 + $0x8] sm:$0xff]  ;;  %v42_v28 = vld [vmem:[%s828_s4] sm:$0xff] }
   0xa   :  { %130 = vperm.xlu0 %551, %v56_v7   ;;  %120 = vperm.xlu1 %552, %v54_v8   ;;  %v532_v27 = vld [vmem:[%s828_s4 + $0xf8] sm:$0xff]  ;;  %v30_v29 = vld [vmem:[%s830_s1 + $0x28] sm:$0xff]  ;;  %v531_v30 = vld [vmem:[%s828_s4 + $0xf0] sm:$0xff] }
   0xb   :  { %v529_v31 = vld [vmem:[%s828_s4 + $0xe0] sm:$0xff]  ;;  %v530_v32 = vld [vmem:[%s828_s4 + $0xe8] sm:$0xff]  ;;  %v31_v33 = vld [vmem:[%s830_s1 + $0x30] sm:$0xff] }
   0xc   :  { %502 = vmatmul.msk.f32.gmra.mxu0 %vm138_vm1, %v26_v9  ;;  %513 = vmatmul.msk.f32.gmra.mxu2 %vm138_vm1, %v37_v10  ;;  %v528_v34 = vld [vmem:[%s828_s4 + $0xd8] sm:$0xff]  ;;  %v526_v35 = vld [vmem:[%s828_s4 + $0xc8] sm:$0xff]  ;;  %v527_v36 = vld [vmem:[%s828_s4 + $0xd0] sm:$0xff] }
   0xd   :  { %v32_v37 = vld [vmem:[%s830_s1 + $0x38] sm:$0xff]  ;;  %v525_v38 = vld [vmem:[%s828_s4 + $0xc0] sm:$0xff]  ;;  %v523_v39 = vld [vmem:[%s828_s4 + $0xb0] sm:$0xff] }
   0xe   :  { %110 = vperm.xlu2 %553, %v52_v11   ;;  %v524_v40 = vld [vmem:[%s828_s4 + $0xb8] sm:$0xff]  ;;  %v33_v42 = vld [vmem:[%s830_s1 + $0x40] sm:$0xff]  ;;  %v522_v43 = vld [vmem:[%s828_s4 + $0xa8] sm:$0xff] }
   0xf   :  { %v520_v44 = vld [vmem:[%s828_s4 + $0x98] sm:$0xff]  ;;  %v521_v45 = vld [vmem:[%s828_s4 + $0xa0] sm:$0xff]  ;;  %v34_v46 = vld [vmem:[%s830_s1 + $0x48] sm:$0xff] }
  0x10   :  { %v519_v47 = vld [vmem:[%s828_s4 + $0x90] sm:$0xff]  ;;  %v517_v48 = vld [vmem:[%s828_s4 + $0x80] sm:$0xff]  ;;  %v518_v49 = vld [vmem:[%s828_s4 + $0x88] sm:$0xff] }
  0x11   :  { %v35_v50 = vld [vmem:[%s830_s1 + $0x50] sm:$0xff]  ;;  %v487_v51 = vld [vmem:[#allocation2] sm:$0x1] }
  0x12   :  { %105 = vperm.xlu0 %551, %v51_v12   ;;  %100 = vperm.xlu1 %552, %v50_v13  }
  0x14   :  { %503 = vmatmul.msk.f32.gmra.mxu0 %vm138_vm1, %v27_v14  ;;  %514 = vmatmul.msk.f32.gmra.mxu2 %vm138_vm1, %v38_v15 }
  0x16   :  { %95 = vperm.xlu2 %553, %v49_v16  }
  0x1a   :  { %90 = vperm.xlu0 %551, %v48_v17   ;;  %85 = vperm.xlu1 %552, %v47_v18  }
  0x1c   :  { %504 = vmatmul.msk.f32.gmra.mxu0 %vm138_vm1, %v28_v19  ;;  %515 = vmatmul.msk.f32.gmra.mxu2 %vm138_vm1, %v39_v20 }
  0x1e   :  { %80 = vperm.xlu2 %553, %v46_v21  }
  0x22   :  { %75 = vperm.xlu0 %551, %v45_v22   ;;  %70 = vperm.xlu1 %552, %v44_v23  }
  0x24   :  { %505 = vmatmul.msk.f32.gmra.mxu0 %vm138_vm1, %v29_v24  ;;  %516 = vmatmul.msk.f32.gmra.mxu2 %vm138_vm1, %v40_v25 }
  0x26   :  { %65 = vperm.xlu2 %553, %v43_v26  }
  0x2a   :  { %382 = vperm.xlu1 %552, %v532_v27   ;;  %60 = vperm.xlu0 %551, %v42_v28  }
  0x2c   :  { %506 = vmatmul.msk.f32.gmra.mxu0 %vm138_vm1, %v30_v29 }
  0x2e   :  { %377 = vperm.xlu2 %553, %v531_v30  }
  0x32   :  { %367 = vperm.xlu1 %552, %v529_v31   ;;  %372 = vperm.xlu0 %551, %v530_v32  }
  0x34   :  { %507 = vmatmul.msk.f32.gmra.mxu0 %vm138_vm1, %v31_v33 }
  0x36   :  { %362 = vperm.xlu2 %553, %v528_v34  }
  0x3a   :  { %352 = vperm.xlu1 %552, %v526_v35   ;;  %357 = vperm.xlu0 %551, %v527_v36  }
  0x3c   :  { %508 = vmatmul.msk.f32.gmra.mxu0 %vm138_vm1, %v32_v37 }
  0x3e   :  { %347 = vperm.xlu2 %553, %v525_v38  }
  0x42   :  { %337 = vperm.xlu1 %552, %v523_v39   ;;  %342 = vperm.xlu0 %551, %v524_v40  }
  0x44   :  { %509 = vmatmul.msk.f32.gmra.mxu0 %vm138_vm1, %v33_v42 }
  0x46   :  { %332 = vperm.xlu2 %553, %v522_v43  }
  0x4a   :  { %322 = vperm.xlu1 %552, %v520_v44   ;;  %327 = vperm.xlu0 %551, %v521_v45  }
  0x4c   :  { %510 = vmatmul.msk.f32.gmra.mxu0 %vm138_vm1, %v34_v46 }
  0x4e   :  { %317 = vperm.xlu2 %553, %v519_v47  }
  0x52   :  { %307 = vperm.xlu1 %552, %v517_v48   ;;  %312 = vperm.xlu0 %551, %v518_v49  }
  0x54   :  { %511 = vmatmul.msk.f32.gmra.mxu0 %vm138_vm1, %v35_v50 }
  0x56   :  { %490 = vperm.xlu2 %553, %v487_v51  }
  0x60   :  { %v116_v10 = vpop.permute.xlu2 %115 }
  0x68   :  { %v111_v16 = vpop.permute.xlu2 %110 }
  0x70   :  { %v96_v21 = vpop.permute.xlu2 %95 }
  0x74   :  { %v136_v59 = vpop.permute.xlu0 %135  ;;  %v126_v60 = vpop.permute.xlu1 %125 }
  0x78   :  { %v81_v29 = vpop.permute.xlu2 %80 }
  0x7c   :  { %v131_v63 = vpop.permute.xlu0 %130  ;;  %v121_v4 = vpop.permute.xlu1 %120 }
  0x80   :  { %v66_v42 = vpop.permute.xlu2 %65 }
  0x81   :  { %v756_v52 = vpop.f32.mrf.mxu0 }
  0x84   :  { %v106_v18 = vpop.permute.xlu0 %105  ;;  %v101_v19 = vpop.permute.xlu1 %100 }
  0x87   :  { %v241_v53 = vpop.f32.mrf.mxu2 }
  0x88   :  { %v242_v11 = vadd.f32 %v241_v53, %v116_v10  ;;  %v272_v53 = vld [vmem:[%s832_s2] sm:$0xff] }
  0x89   :  { %v758_v54 = vpop.f32.mrf.mxu0 }
  0x8a   :  { %v267_v14 = vmax.f32 %v242_v11, 0.0  ;;  %v212_v46 = vadd.f32 %v758_v54, %v66_v42  ;;  %v280_v54 = vld [vmem:[%s832_s2 + $0x40] sm:$0xff] }
  0x8c   :  { %v91_v22 = vpop.permute.xlu0 %90  ;;  %v86_v26 = vpop.permute.xlu1 %85  ;;  %v257_v50 = vmax.f32 %v212_v46, 0.0 }
  0x8f   :  { %v244_v55 = vpop.f32.mrf.mxu2 }
  0x90   :  { %v245_v6 = vadd.f32 %v244_v55, %v121_v4  ;;  %v281_v55 = vld [vmem:[%s832_s2 + $0x48] sm:$0xff] }
  0x91   :  { %v760_v56 = vpop.f32.mrf.mxu0 }
  0x92   :  { %v268_v12 = vmax.f32 %v245_v6, 0.0 }
  0x94   :  { %v76_v32 = vpop.permute.xlu0 %75  ;;  %v71_v39 = vpop.permute.xlu1 %70 }
  0x95   :  { %v215_v43 = vadd.f32 %v760_v56, %v71_v39  ;;  %v274_v56 = vld [vmem:[%s832_s2 + $0x10] sm:$0xff] }
  0x97   :  { %v247_v57 = vpop.f32.mrf.mxu2  ;;  %v258_v48 = vmax.f32 %v215_v43, 0.0 }
  0x98   :  { %v248_v2 = vadd.f32 %v247_v57, %v126_v60  ;;  %v282_v57 = vld [vmem:[%s832_s2 + $0x50] sm:$0xff]  ;;  %v276_v60 = vld [vmem:[%s832_s2 + $0x20] sm:$0xff] }
  0x99   :  { %v762_v58 = vpop.f32.mrf.mxu0 }
  0x9a   :  { %v269_v9 = vmax.f32 %v248_v2, 0.0  ;;  %v218_v40 = vadd.f32 %v762_v58, %v76_v32  ;;  %v275_v58 = vld [vmem:[%s832_s2 + $0x18] sm:$0xff] }
  0x9b   :  { %v279_v2 = vld [vmem:[%s832_s2 + $0x38] sm:$0xff] }
  0x9c   :  { %v61_v45 = vpop.permute.xlu0 %60  ;;  %v259_v47 = vmax.f32 %v218_v40, 0.0 }
  0x9d   :  { %v209_v49 = vadd.f32 %v756_v52, %v61_v45  ;;  %v273_v52 = vld [vmem:[%s832_s2 + $0x8] sm:$0xff] }
  0x9f   :  { %v250_v61 = vpop.f32.mrf.mxu2  ;;  %v256_v51 = vmax.f32 %v209_v49, 0.0 }
  0xa0   :  { %v251_v0 = vadd.f32 %v250_v61, %v131_v63  ;;  %v284_v61 = vld [vmem:[%s832_s2 + $0x60] sm:$0xff]  ;;  %v285_v63 = vld [vmem:[%s832_s2 + $0x68] sm:$0xff] }
  0xa1   :  { %v220_v62 = vpop.f32.mrf.mxu0 }
  0xa2   :  { %v270_v7 = vmax.f32 %v251_v0, 0.0  ;;  %v221_v37 = vadd.f32 %v220_v62, %v81_v29  ;;  %v277_v62 = vld [vmem:[%s832_s2 + $0x28] sm:$0xff]  ;;  %v278_v0 = vld [vmem:[%s832_s2 + $0x30] sm:$0xff] }
  0xa4   :  { %v260_v44 = vmax.f32 %v221_v37, 0.0 }
  0xa7   :  { %v253_v1 = vpop.f32.mrf.mxu2 }
  0xa8   :  { %v254_v3 = vadd.f32 %v253_v1, %v136_v59  ;;  %v283_v59 = vld [vmem:[%s832_s2 + $0x58] sm:$0xff]  ;;  %v286_v1 = vld [vmem:[%s832_s2 + $0x70] sm:$0xff] }
  0xa9   :  { %v223_v5 = vpop.f32.mrf.mxu0 }
  0xaa   :  { %v271_v8 = vmax.f32 %v254_v3, 0.0  ;;  %v224_v35 = vadd.f32 %v223_v5, %v86_v26  ;;  %v287_v3 = vld [vmem:[%s832_s2 + $0x78] sm:$0xff] }
  0xac   :  { %385 = vmatpush.msra.mxu1 %v271_v8  ;;  %534 = vmatpush.msra.mxu3 %v271_v8  ;;  %v261_v41 = vmax.f32 %v224_v35, 0.0 }
  0xae   :  { %386 = vmatpush.msra.mxu1 %v270_v7  ;;  %535 = vmatpush.msra.mxu3 %v270_v7 }
  0xb0   :  { %387 = vmatpush.msra.mxu1 %v269_v9  ;;  %536 = vmatpush.msra.mxu3 %v269_v9 }
  0xb1   :  { %v226_v13 = vpop.f32.mrf.mxu0 }
  0xb2   :  { %388 = vmatpush.msra.mxu1 %v268_v12  ;;  %537 = vmatpush.msra.mxu3 %v268_v12  ;;  %v227_v33 = vadd.f32 %v226_v13, %v91_v22  ;;  %v383_v13 = vpop.permute.xlu1 %382 }
  0xb4   :  { %389 = vmatpush.msra.mxu1 %v267_v14  ;;  %538 = vmatpush.msra.mxu3 %v267_v14  ;;  %v262_v38 = vmax.f32 %v227_v33, 0.0 }
  0xb9   :  { %v229_v15 = vpop.f32.mrf.mxu0 }
  0xba   :  { %v230_v30 = vadd.f32 %v229_v15, %v96_v21  ;;  %v378_v15 = vpop.permute.xlu2 %377 }
  0xbc   :  { %v263_v36 = vmax.f32 %v230_v30, 0.0 }
  0xc1   :  { %v232_v17 = vpop.f32.mrf.mxu0 }
  0xc2   :  { %v233_v27 = vadd.f32 %v232_v17, %v101_v19  ;;  %v373_v17 = vpop.permute.xlu0 %372  ;;  %v363_v21 = vpop.permute.xlu2 %362 }
  0xc4   :  { %v264_v34 = vmax.f32 %v233_v27, 0.0 }
  0xc9   :  { %v235_v20 = vpop.f32.mrf.mxu0 }
  0xca   :  { %v236_v24 = vadd.f32 %v235_v20, %v106_v18  ;;  %v368_v18 = vpop.permute.xlu1 %367  ;;  %v358_v22 = vpop.permute.xlu0 %357 }
  0xcb   :  { %v348_v30 = vpop.permute.xlu2 %347 }
  0xcc   :  { %v265_v31 = vmax.f32 %v236_v24, 0.0 }
  0xd1   :  { %v238_v23 = vpop.f32.mrf.mxu0 }
  0xd2   :  { %v239_v25 = vadd.f32 %v238_v23, %v111_v16  ;;  %v353_v23 = vpop.permute.xlu1 %352  ;;  %v343_v33 = vpop.permute.xlu0 %342 }
  0xd4   :  { %v266_v28 = vmax.f32 %v239_v25, 0.0 }
  0xd6   :  { %390 = vmatpush.msra.mxu1 %v266_v28  ;;  %539 = vmatpush.msra.mxu3 %v266_v28 }
  0xd8   :  { %391 = vmatpush.msra.mxu1 %v265_v31  ;;  %540 = vmatpush.msra.mxu3 %v265_v31 }
  0xda   :  { %392 = vmatpush.msra.mxu1 %v264_v34  ;;  %541 = vmatpush.msra.mxu3 %v264_v34 }
  0xdc   :  { %393 = vmatpush.msra.mxu1 %v263_v36  ;;  %542 = vmatpush.msra.mxu3 %v263_v36  ;;  %v338_v36 = vpop.permute.xlu1 %337 }
  0xde   :  { %394 = vmatpush.msra.mxu1 %v262_v38  ;;  %543 = vmatpush.msra.mxu3 %v262_v38 }
  0xe0   :  { %395 = vmatpush.msra.mxu1 %v261_v41  ;;  %544 = vmatpush.msra.mxu3 %v261_v41 }
  0xe2   :  { %396 = vmatpush.msra.mxu1 %v260_v44  ;;  %545 = vmatpush.msra.mxu3 %v260_v44  ;;  %v333_v44 = vpop.permute.xlu2 %332 }
  0xe4   :  { %397 = vmatpush.msra.mxu1 %v259_v47  ;;  %546 = vmatpush.msra.mxu3 %v259_v47  ;;  %v328_v47 = vpop.permute.xlu0 %327 }
  0xe6   :  { %398 = vmatpush.msra.mxu1 %v258_v48  ;;  %547 = vmatpush.msra.mxu3 %v258_v48 }
  0xe8   :  { %399 = vmatpush.msra.mxu1 %v257_v50  ;;  %548 = vmatpush.msra.mxu3 %v257_v50  ;;  %v323_v50 = vpop.permute.xlu1 %322 }
  0xea   :  { %400 = vmatpush.msra.mxu1 %v256_v51  ;;  %549 = vmatpush.msra.mxu3 %v256_v51 }
  0xeb   :  { %401 = vmatmul.f32.vlgmr.msra.gmra.mxu1 %v272_v53  ;;  %425 = vmatmul.f32.vlgmr.msra.gmra.mxu3 %v280_v54 }
  0xf3   :  { %404 = vmatmul.f32.gmra.mxu1 %v273_v52  ;;  %428 = vmatmul.f32.gmra.mxu3 %v281_v55 }
  0xfb   :  { %407 = vmatmul.f32.gmra.mxu1 %v274_v56  ;;  %431 = vmatmul.f32.gmra.mxu3 %v282_v57  ;;  %v318_v57 = vpop.permute.xlu2 %317 }
 0x103   :  { %410 = vmatmul.f32.gmra.mxu1 %v275_v58  ;;  %434 = vmatmul.f32.gmra.mxu3 %v283_v59 }
 0x10b   :  { %413 = vmatmul.f32.gmra.mxu1 %v276_v60  ;;  %437 = vmatmul.f32.gmra.mxu3 %v284_v61  ;;  %v313_v60 = vpop.permute.xlu0 %312 }
 0x113   :  { %416 = vmatmul.f32.gmra.mxu1 %v277_v62  ;;  %440 = vmatmul.f32.gmra.mxu3 %v285_v63  ;;  %v308_v63 = vpop.permute.xlu1 %307 }
 0x11b   :  { %419 = vmatmul.f32.gmra.mxu1 %v278_v0  ;;  %443 = vmatmul.f32.gmra.mxu3 %v286_v1 }
 0x123   :  { %422 = vmatmul.f32.gmra.mxu1 %v279_v2  ;;  %446 = vmatmul.f32.gmra.mxu3 %v287_v3 }
 0x168   :  { %v816_v4 = vpop.f32.mrf.mxu1 }
 0x169   :  { %v403_v0 = vadd.f32 %v816_v4, %v308_v63 }
 0x16b   :  { %v450_v3 = vmax.f32 %v403_v0, 0.0 }
 0x16e   :  { %v426_v5 = vpop.f32.mrf.mxu3 }
 0x16f   :  { %v427_v42 = vadd.f32 %v426_v5, %v348_v30  ;;  %v466_v5 = vld [vmem:[%s833_s3] sm:$0xff] }
 0x170   :  { %v818_v6 = vpop.f32.mrf.mxu1 }
 0x171   :  { %v458_v48 = vmax.f32 %v427_v42, 0.0  ;;  %v406_v61 = vadd.f32 %v818_v6, %v313_v60 }
 0x173   :  { %v451_v2 = vmax.f32 %v406_v61, 0.0 }
 0x176   :  { %v429_v7 = vpop.f32.mrf.mxu3 }
 0x177   :  { %v430_v39 = vadd.f32 %v429_v7, %v353_v23  ;;  %v491_v7 = vpop.permute.xlu2 %490 }
 0x178   :  { %v408_v9 = vpop.f32.mrf.mxu1 }
 0x179   :  { %v459_v45 = vmax.f32 %v430_v39, 0.0  ;;  %v409_v58 = vadd.f32 %v408_v9, %v318_v57 }
 0x17b   :  { %v452_v1 = vmax.f32 %v409_v58, 0.0 }
 0x17e   :  { %v432_v8 = vpop.f32.mrf.mxu3 }
 0x17f   :  { %v433_v37 = vadd.f32 %v432_v8, %v358_v22  ;;  %v493_v8 = vperm.slane %v491_v7, 0 }
 0x180   :  { %v411_v11 = vpop.f32.mrf.mxu1 }
 0x181   :  { %v460_v43 = vmax.f32 %v433_v37, 0.0  ;;  %v412_v55 = vadd.f32 %v411_v11, %v323_v50 }
 0x183   :  { %v453_v62 = vmax.f32 %v412_v55, 0.0 }
 0x186   :  { %v435_v10 = vpop.f32.mrf.mxu3 }
 0x187   :  { %v436_v34 = vadd.f32 %v435_v10, %v363_v21 }
 0x188   :  { %v414_v14 = vpop.f32.mrf.mxu1 }
 0x189   :  { %v461_v40 = vmax.f32 %v436_v34, 0.0  ;;  %v415_v54 = vadd.f32 %v414_v14, %v328_v47 }
 0x18b   :  { %v454_v59 = vmax.f32 %v415_v54, 0.0 }
 0x18e   :  { %v438_v12 = vpop.f32.mrf.mxu3 }
 0x18f   :  { %v439_v31 = vadd.f32 %v438_v12, %v368_v18 }
 0x190   :  { %v417_v19 = vpop.f32.mrf.mxu1 }
 0x191   :  { %v462_v38 = vmax.f32 %v439_v31, 0.0  ;;  %v418_v51 = vadd.f32 %v417_v19, %v333_v44 }
 0x193   :  { %v455_v56 = vmax.f32 %v418_v51, 0.0 }
 0x196   :  { %v441_v16 = vpop.f32.mrf.mxu3 }
 0x197   :  { %v442_v28 = vadd.f32 %v441_v16, %v373_v17 }
 0x198   :  { %v420_v27 = vpop.f32.mrf.mxu1 }
 0x199   :  { %v463_v35 = vmax.f32 %v442_v28, 0.0  ;;  %v421_v49 = vadd.f32 %v420_v27, %v338_v36 }
 0x19b   :  { %v456_v52 = vmax.f32 %v421_v49, 0.0 }
 0x19e   :  { %v444_v20 = vpop.f32.mrf.mxu3 }
 0x19f   :  { %v445_v25 = vadd.f32 %v444_v20, %v378_v15 }
 0x1a0   :  { %v423_v41 = vpop.f32.mrf.mxu1 }
 0x1a1   :  { %v464_v32 = vmax.f32 %v445_v25, 0.0  ;;  %v424_v46 = vadd.f32 %v423_v41, %v343_v33 }
 0x1a3   :  { %v457_v53 = vmax.f32 %v424_v46, 0.0 }
 0x1a6   :  { %v447_v24 = vpop.f32.mrf.mxu3 }
 0x1a7   :  { %v448_v26 = vadd.f32 %v447_v24, %v383_v13 }
 0x1a9   :  { %v465_v29 = vmax.f32 %v448_v26, 0.0 }
 0x1ab   :  { %467 = vmatpush.msrb.mxu2 %v465_v29 }
 0x1ad   :  { %468 = vmatpush.msrb.mxu2 %v464_v32 }
 0x1af   :  { %469 = vmatpush.msrb.mxu2 %v463_v35 }
 0x1b1   :  { %470 = vmatpush.msrb.mxu2 %v462_v38 }
 0x1b3   :  { %471 = vmatpush.msrb.mxu2 %v461_v40 }
 0x1b5   :  { %472 = vmatpush.msrb.mxu2 %v460_v43 }
 0x1b7   :  { %473 = vmatpush.msrb.mxu2 %v459_v45 }
 0x1b9   :  { %474 = vmatpush.msrb.mxu2 %v458_v48 }
 0x1bb   :  { %475 = vmatpush.msrb.mxu2 %v457_v53 }
 0x1bd   :  { %476 = vmatpush.msrb.mxu2 %v456_v52 }
 0x1bf   :  { %477 = vmatpush.msrb.mxu2 %v455_v56 }
 0x1c1   :  { %478 = vmatpush.msrb.mxu2 %v454_v59 }
 0x1c3   :  { %479 = vmatpush.msrb.mxu2 %v453_v62 }
 0x1c5   :  { %480 = vmatpush.msrb.mxu2 %v452_v1 }
 0x1c7   :  { %481 = vmatpush.msrb.mxu2 %v451_v2 }
 0x1c9   :  { %482 = vmatpush.msrb.mxu2 %v450_v3 }
 0x1ca   :  { %483 = vmatmul.f32.vlgmr.msrb.gmra.mxu2 %v466_v5 }
 0x24d   :  { %v484_v6 = vpop.f32.mrf.mxu2 }
 0x24e   :  { %v494_v9 = vadd.f32 %v493_v8, %v484_v6 }
 0x250   :  { %495 = vst [vmem:[%s834_s6] sm:$0x1] %v494_v9 }

</bundles_post_ra>
